<compile_context>
chip_gen: v7x
topology: tpu7x:2x2x1
jax: 0.10.0
libtpu: 0.0.40
codegen_flags: <defaults>
</compile_context>

<pallas_src>
import functools
import math

import jax
import jax.numpy as jnp
from jax.experimental import pallas as pl
from jax.experimental.pallas import tpu as pltpu

_LANE = 128
_SUBLANE = 8


# -----------------------------------------------------------------------------
# Small helpers
# -----------------------------------------------------------------------------
def _cdiv(a, b):
    return -(-a // b)


def _round_up(x, m):
    return _cdiv(x, m) * m


def _pad_to(x, axis, target):
    pad = target - x.shape[axis]
    if pad <= 0:
        return x
    widths = [(0, 0)] * x.ndim
    widths[axis] = (0, pad)
    return jnp.pad(x, widths)


# -----------------------------------------------------------------------------
# Hardware-aware sizing (lazy; v5e/v6e: 128 MiB VMEM, v7x: 64 MiB)
# -----------------------------------------------------------------------------
@functools.lru_cache(maxsize=None)
def _vmem_capacity_bytes() -> int:
    try:
        cap = getattr(pltpu.get_tpu_info(), "vmem_capacity_bytes", None)
        if cap:
            return int(cap)
    except Exception:
        pass
    try:
        kind = jax.devices()[0].device_kind.lower()
        if "v7" in kind:
            return 64 * 1024 * 1024
        return 128 * 1024 * 1024          # v5e / v6e
    except Exception:
        return 128 * 1024 * 1024


@functools.lru_cache(maxsize=None)
def _vmem_limit_bytes() -> int:
    # Scoped VMEM handed to Mosaic: generous on 128 MiB parts, smaller on
    # 64 MiB parts; always leave >= 25% headroom.
    return int(min(96 * 1024 * 1024, (_vmem_capacity_bytes() * 3) // 4))


def _choose_row_tile(m, k, f, n):
    """Row tile for the streamed M axis of the fused MLP, derived from the
    actual per-step VMEM footprint instead of a fixed cap."""
    limit = _vmem_limit_bytes()
    resident = 2 * (k * f + f * n) + 4 * (f + n)          # bf16 weights + f32 biases
    per_row = 2 * 4 * (k + n) + 4 * (f + n)               # double-buffered x/out + f32 h,y
    budget = max(limit // 2 - 2 * resident, per_row * _SUBLANE)
    tm = max(_SUBLANE, min(budget // per_row, 2048))
    tm = (tm // _SUBLANE) * _SUBLANE
    # Guarantee >= 2 grid steps when there is enough work so v7x's second
    # TensorCore (dimension_semantics="parallel") has something to do.
    if m > _SUBLANE:
        tm = min(tm, _round_up(_cdiv(m, 2), _SUBLANE))
    tm = max(_SUBLANE, min(tm, _round_up(m, _SUBLANE)))
    return tm


def _choose_batch_tile(b, nq, nk, dp, vp):
    """Batch tile for the fused ID decoder (whole key axis resident per block)."""
    limit = _vmem_limit_bytes()
    per_b = 2 * 4 * (3 * nq * dp + 3 * nk * dp + 2 * nq * nk + nq * vp)
    resident = 2 * (4 * dp * dp + dp * vp)
    budget = max(limit // 2 - 2 * resident, per_b)
    bb = max(1, min(b, budget // per_b))
    if b > 1:
        bb = min(bb, _cdiv(b, 2))      # >= 2 grid steps for v7x megacore
    return bb


# -----------------------------------------------------------------------------
# Pallas kernel 1: fused two-layer MLP (optionally residual)
#   y = relu(x @ w1 + b1) @ w2 + b2 (+ x)
# Grid streams row-tiles of x; weights stay VMEM-resident; the (tm, F)
# intermediate never touches HBM.  Matmul operands are bf16, accumulation and
# all elementwise math f32.
# -----------------------------------------------------------------------------
def _fused_mlp_kernel(x_ref, w1_ref, b1_ref, w2_ref, b2_ref, o_ref, *, residual):
    x = x_ref[...]                                              # (tm, K) f32
    h = jnp.dot(x.astype(w1_ref.dtype), w1_ref[...],
                preferred_element_type=jnp.float32) + b1_ref[...]
    h = jnp.maximum(h, 0.0)                                     # f32 VPU (v5e-safe)
    y = jnp.dot(h.astype(w2_ref.dtype), w2_ref[...],
                preferred_element_type=jnp.float32) + b2_ref[...]
    if residual:
        y = y + x                                               # exact widths match
    o_ref[...] = y.astype(o_ref.dtype)


def fused_mlp(x, w1, b1, w2, b2, *, residual=False):
    """x: (..., K) true width (no K padding); w1: (K, F) bf16; w2: (F, N) bf16;
    biases f32 shaped (1, F)/(1, N)."""
    lead = x.shape[:-1]
    K = x.shape[-1]
    F = w1.shape[-1]
    N = w2.shape[-1]
    assert w1.shape[0] == K and w2.shape[0] == F
    if residual:
        assert K == N, "residual MLP requires matching in/out widths"

    x2 = x.reshape(-1, K)
    M = x2.shape[0]
    tm = _choose_row_tile(M, K, F, N)
    Mp = _round_up(M, tm)
    x2 = _pad_to(x2, 0, Mp)

    flops = 2 * Mp * (K * F + F * N)
    bytes_accessed = 4 * Mp * K + 2 * (K * F + F * N) + 4 * (F + N) + 4 * Mp * N

    out = pl.pallas_call(
        functools.partial(_fused_mlp_kernel, residual=residual),
        out_shape=jax.ShapeDtypeStruct((Mp, N), x.dtype),
        grid=(Mp // tm,),
        in_specs=[
            pl.BlockSpec((tm, K), lambda i: (i, 0)),
            pl.BlockSpec((K, F), lambda i: (0, 0)),
            pl.BlockSpec((1, F), lambda i: (0, 0)),
            pl.BlockSpec((F, N), lambda i: (0, 0)),
            pl.BlockSpec((1, N), lambda i: (0, 0)),
        ],
        out_specs=pl.BlockSpec((tm, N), lambda i: (i, 0)),
        compiler_params=pltpu.CompilerParams(
            dimension_semantics=("parallel",),
            vmem_limit_bytes=_vmem_limit_bytes(),
        ),
        cost_estimate=pl.CostEstimate(
            flops=int(flops), transcendentals=0,
            bytes_accessed=int(bytes_accessed)),
    )(x2, w1, b1, w2, b2)
    return out[:M].reshape(*lead, N)


# -----------------------------------------------------------------------------
# Pallas kernel 2: fused ID decoder
#   q = cur @ wq + bq          (1/sqrt(D) folded into wq/bq at init)
#   [k|v] = tok @ [wk|wv] + [bk|bv]     (one wide matmul)
#   attn = softmax(q k^T) v             (batched; mask elided when keys full)
#   dec  = cur + (attn @ wo + bo)
#   logits = dec @ wh + bh              (lane-dense Vp)
# A few batch elements per block; grid chunks the batch.
# TODO(synk): for large T*N add a key-tiled online-softmax (flash-style) path;
# the whole key axis is VMEM-resident per block here, fine for small T*N.
# -----------------------------------------------------------------------------
def _id_decoder_kernel(cur_ref, tok_ref, wq_ref, bq_ref, wkv_ref, bkv_ref,
                       wo_ref, bo_ref, wh_ref, bh_ref, o_ref, *, nk_valid):
    bb, nqp, dp = cur_ref.shape
    nkp = tok_ref.shape[1]
    vp = wh_ref.shape[1]

    cur2 = cur_ref[...].reshape(bb * nqp, dp)                   # f32
    tok2 = tok_ref[...].reshape(bb * nkp, dp)

    # Q projection and fused (concatenated) K/V projection, bf16 operands.
    q2 = jnp.dot(cur2.astype(wq_ref.dtype), wq_ref[...],
                 preferred_element_type=jnp.float32) + bq_ref[...]
    kv2 = jnp.dot(tok2.astype(wkv_ref.dtype), wkv_ref[...],
                  preferred_element_type=jnp.float32) + bkv_ref[...]
    q = q2.reshape(bb, nqp, dp)
    k = kv2[:, :dp].reshape(bb, nkp, dp)
    v = kv2[:, dp:].reshape(bb, nkp, dp)

    # Batched scores (scale already folded into wq), contracting last dims.
    s = jnp.einsum("bqd,bkd->bqk", q.astype(jnp.bfloat16), k.astype(jnp.bfloat16),
                   preferred_element_type=jnp.float32)
    if nk_valid < nkp:                                          # trace-time elision
        kidx = jax.lax.broadcasted_iota(jnp.int32, (1, 1, nkp), 2)
        s = jnp.where(kidx < nk_valid, s, -1e30)                # finite fill: no NaN

    m = jnp.max(s, axis=-1, keepdims=True)
    p = jnp.exp(s - m)
    denom = jnp.sum(p, axis=-1, keepdims=True)
    p = p * pl.reciprocal(denom, approx=True)                   # EUP divide

    attn = jnp.einsum("bqk,bkd->bqd", p.astype(jnp.bfloat16), v.astype(jnp.bfloat16),
                      preferred_element_type=jnp.float32)
    attn2 = attn.reshape(bb * nqp, dp)

    # Output projection + residual + ID-vocabulary head epilogue.
    dec2 = cur2 + (jnp.dot(attn2.astype(wo_ref.dtype), wo_ref[...],
                           preferred_element_type=jnp.float32) + bo_ref[...])
    logits2 = jnp.dot(dec2.astype(wh_ref.dtype), wh_ref[...],
                      preferred_element_type=jnp.float32) + bh_ref[...]
    o_ref[...] = logits2.reshape(bb, nqp, vp).astype(o_ref.dtype)


def id_decoder_attention(cur_p, tok_p, wq, bq, wkv, bkv, wo, bo, wh, bh, *, nk_valid):
    """cur_p: (B, Nqp, Dp) padded queries; tok_p: (B, Nkp, Dp) padded trajectory
    tokens.  Returns padded logits (B, Nqp, Vp)."""
    B, Nqp, Dp = cur_p.shape
    Nkp = tok_p.shape[1]
    Vp = wh.shape[1]

    bb = _choose_batch_tile(B, Nqp, Nkp, Dp, Vp)
    Bp = _round_up(B, bb)
    cur_p = _pad_to(cur_p, 0, Bp)
    tok_p = _pad_to(tok_p, 0, Bp)

    flops = 2 * Bp * (Nqp * Dp * Dp + Nkp * Dp * 2 * Dp
                      + 2 * Nqp * Nkp * Dp + Nqp * Dp * Dp + Nqp * Dp * Vp)
    bytes_accessed = (4 * Bp * (Nqp * Dp + Nkp * Dp + Nqp * Vp)
                      + 2 * (4 * Dp * Dp + Dp * Vp) + 4 * (5 * Dp + Vp))

    out = pl.pallas_call(
        functools.partial(_id_decoder_kernel, nk_valid=nk_valid),
        out_shape=jax.ShapeDtypeStruct((Bp, Nqp, Vp), cur_p.dtype),
        grid=(Bp // bb,),
        in_specs=[
            pl.BlockSpec((bb, Nqp, Dp), lambda i: (i, 0, 0)),
            pl.BlockSpec((bb, Nkp, Dp), lambda i: (i, 0, 0)),
            pl.BlockSpec((Dp, Dp), lambda i: (0, 0)),
            pl.BlockSpec((1, Dp), lambda i: (0, 0)),
            pl.BlockSpec((Dp, 2 * Dp), lambda i: (0, 0)),
            pl.BlockSpec((1, 2 * Dp), lambda i: (0, 0)),
            pl.BlockSpec((Dp, Dp), lambda i: (0, 0)),
            pl.BlockSpec((1, Dp), lambda i: (0, 0)),
            pl.BlockSpec((Dp, Vp), lambda i: (0, 0)),
            pl.BlockSpec((1, Vp), lambda i: (0, 0)),
        ],
        out_specs=pl.BlockSpec((bb, Nqp, Vp), lambda i: (i, 0, 0)),
        compiler_params=pltpu.CompilerParams(
            dimension_semantics=("parallel",),
            vmem_limit_bytes=_vmem_limit_bytes(),
        ),
        cost_estimate=pl.CostEstimate(
            flops=int(flops),
            transcendentals=int(Bp * Nqp * Nkp),
            bytes_accessed=int(bytes_accessed)),
    )(cur_p, tok_p, wq, bq, wkv, bkv, wo, bo, wh, bh)
    return out[:B]


# -----------------------------------------------------------------------------
# Deterministic parameter init (weights bf16 for the MXU, biases f32)
# -----------------------------------------------------------------------------
def _init_linear(key, k_in, k_out):
    kw, kb = jax.random.split(key)
    scale = 1.0 / math.sqrt(k_in)
    w = jax.random.uniform(kw, (k_in, k_out), jnp.float32, -scale, scale)
    b = jax.random.uniform(kb, (k_out,), jnp.float32, -scale, scale)
    return w, b


# -----------------------------------------------------------------------------
# Synthetic MOTIP sub-modules (hot paths are the fused Pallas kernels above)
# -----------------------------------------------------------------------------
class FeatureExtractor:
    """Abstracted DETR feature extractor: annotation features -> embeddings.
    Both linears (ReLU between) fused into one Pallas kernel.  The streamed
    input keeps its true d_in width; hidden/output are lane-padded (weights
    are tiny and VMEM-resident)."""

    def __init__(self, key, d_in, d_model):
        self.d_in, self.d_model = d_in, d_model
        fp = _round_up(d_model, _LANE)
        k1, k2 = jax.random.split(key)
        w1, b1 = _init_linear(k1, d_in, d_model)
        w2, b2 = _init_linear(k2, d_model, d_model)
        self.w1 = _pad_to(w1, 1, fp).astype(jnp.bfloat16)                 # (d_in, fp)
        self.b1 = _pad_to(b1, 0, fp).reshape(1, fp)
        self.w2 = _pad_to(_pad_to(w2, 0, fp), 1, fp).astype(jnp.bfloat16)  # (fp, fp)
        self.b2 = _pad_to(b2, 0, fp).reshape(1, fp)

    def __call__(self, annotations):
        x = annotations["features"]                       # (B, N, d_in) — no K padding
        yp = fused_mlp(x, self.w1, self.b1, self.w2, self.b2, residual=False)
        return yp[..., : self.d_model]                    # (B, N, d_model)


class TrajectoryModeling:
    """Residual FFN over trajectory tokens, fully fused (x -> relu FFN -> +x).
    Input and output keep the true d_model width so the residual is exact."""

    def __init__(self, key, d_model, d_ffn):
        self.d_model = d_model
        fp = _round_up(d_ffn, _LANE)
        k1, k2 = jax.random.split(key)
        w1, b1 = _init_linear(k1, d_model, d_ffn)
        w2, b2 = _init_linear(k2, d_ffn, d_model)
        self.w1 = _pad_to(w1, 1, fp).astype(jnp.bfloat16)   # (d_model, fp)
        self.b1 = _pad_to(b1, 0, fp).reshape(1, fp)
        self.w2 = _pad_to(w2, 0, fp).astype(jnp.bfloat16)   # (fp, d_model): true out width
        self.b2 = b2.reshape(1, d_model)

    def __call__(self, seq_info):
        x = seq_info["trajectory_features"]               # (B, T, N, D)
        y = fused_mlp(x, self.w1, self.b1, self.w2, self.b2, residual=True)
        out = dict(seq_info)
        out["trajectory_features"] = y
        return out


class IDDecoder:
    """Cross-attention of current detections over trajectory tokens + ID head.
    Q / fused-KV projections, attention, out-proj, residual and the
    ID-vocabulary head all run inside a single Pallas kernel.  The 1/sqrt(D)
    attention scale is folded into the Q projection at init."""

    def __init__(self, key, d_model, num_id_vocabulary):
        self.num_id_vocabulary = num_id_vocabulary
        self.d_model = d_model
        self.d_pad = _round_up(d_model, _LANE)
        dp = self.d_pad
        vp = _round_up(num_id_vocabulary + 1, _LANE)
        kq, kk, kv, ko, kh = jax.random.split(key, 5)
        wq, bq = _init_linear(kq, d_model, d_model)
        wk, bk = _init_linear(kk, d_model, d_model)
        wv, bv = _init_linear(kv, d_model, d_model)
        wo, bo = _init_linear(ko, d_model, d_model)
        wh, bh = _init_linear(kh, d_model, num_id_vocabulary + 1)
        # Fold the 1/sqrt(D) attention scale into the Q projection (free, exact).
        inv_scale = 1.0 / math.sqrt(d_model)
        wq = wq * inv_scale
        bq = bq * inv_scale

        def padw(w):
            return _pad_to(_pad_to(w, 0, dp), 1, dp).astype(jnp.bfloat16)

        self.wq = padw(wq)
        self.bq = _pad_to(bq, 0, dp).reshape(1, dp)
        # Fused K/V projection: one (Dp, 2*Dp) weight -> one wide MXU pass and
        # a single read of the trajectory tokens.
        self.wkv = jnp.concatenate([padw(wk), padw(wv)], axis=1)
        self.bkv = jnp.concatenate([_pad_to(bk, 0, dp), _pad_to(bv, 0, dp)]).reshape(1, 2 * dp)
        self.wo = padw(wo)
        self.bo = _pad_to(bo, 0, dp).reshape(1, dp)
        # +1 for the "newborn" ID token, as in MOTIP; lane-dense padded head.
        self.wh = _pad_to(_pad_to(wh, 0, dp), 1, vp).astype(jnp.bfloat16)
        self.bh = _pad_to(bh, 0, vp).reshape(1, vp)

    def __call__(self, seq_info, use_decoder_checkpoint=False):
        # TODO(synk): `use_decoder_checkpoint` is a training-time memory trick
        # (torch.utils.checkpoint); it does not change forward values, so it is
        # accepted and ignored here.
        traj = seq_info["trajectory_features"]            # (B, T, N, D)
        cur = seq_info["current_features"]                # (B, Nq, D)
        B, T, N, D = traj.shape
        Nq = cur.shape[1]
        Dp = self.d_pad

        tok = traj.reshape(B, T * N, D)
        tok_p = _pad_to(_pad_to(tok, 2, Dp), 1, _round_up(T * N, _SUBLANE))
        cur_p = _pad_to(_pad_to(cur, 2, Dp), 1, _round_up(Nq, _SUBLANE))

        logits_p = id_decoder_attention(
            cur_p, tok_p, self.wq, self.bq, self.wkv, self.bkv,
            self.wo, self.bo, self.wh, self.bh, nk_valid=T * N)
        return logits_p[:, :Nq, : self.num_id_vocabulary + 1]


# -----------------------------------------------------------------------------
# MOTIP dispatcher (mirrors the PyTorch forward exactly)
# -----------------------------------------------------------------------------
class MOTIP:
    def __init__(self, only_detr, feature_extractor, trajectory_modeling, id_decoder):
        self.only_detr = only_detr
        self.feature_extractor = feature_extractor
        self.trajectory_modeling = trajectory_modeling
        self.id_decoder = id_decoder
        if self.id_decoder is not None:
            self.num_id_vocabulary = self.id_decoder.num_id_vocabulary
        else:
            self.num_id_vocabulary = 1000

    def forward(self, **kwargs):
        assert "part" in kwargs, "Parameter `part` is required for MOTIP forward."
        match kwargs["part"]:
            case "feature_extractor":
                annotations = kwargs["annotations"]
                return self.feature_extractor(annotations)
            case "trajectory_modeling":
                seq_info = kwargs["seq_info"]
                return self.trajectory_modeling(seq_info)
            case "id_decoder":
                seq_info = kwargs["seq_info"]
                use_decoder_checkpoint = kwargs.get("use_decoder_checkpoint", False)
                return self.id_decoder(
                    seq_info, use_decoder_checkpoint=use_decoder_checkpoint
                )
            case _:
                raise NotImplementedError(
                    f"MOTIP forwarding doesn't support part={kwargs['part']}."
                )

    __call__ = forward


# -----------------------------------------------------------------------------
# Pure-JAX references (mirror the kernel's bf16-operand / f32-accumulate math)
# -----------------------------------------------------------------------------
def _mm(a, w_bf16, b_f32):
    return jnp.dot(a.astype(jnp.bfloat16), w_bf16,
                   preferred_element_type=jnp.float32) + b_f32


def _ref_feature_extractor(fe, annotations):
    x = annotations["features"]
    h = jnp.maximum(_mm(x, fe.w1, fe.b1), 0.0)
    return _mm(h, fe.w2, fe.b2)[..., : fe.d_model]


def _ref_trajectory_modeling(tm_mod, seq_info):
    x = seq_info["trajectory_features"]
    h = jnp.maximum(_mm(x, tm_mod.w1, tm_mod.b1), 0.0)
    return _mm(h, tm_mod.w2, tm_mod.b2) + x


def _ref_id_decoder(dec, seq_info):
    traj = seq_info["trajectory_features"]
    cur = seq_info["current_features"]
    B, T, N, D = traj.shape
    Dp = dec.d_pad
    tok = _pad_to(traj.reshape(B, T * N, D), 2, Dp)
    cur_p = _pad_to(cur, 2, Dp)
    q = _mm(cur_p, dec.wq, dec.bq)
    kv = _mm(tok, dec.wkv, dec.bkv)
    k, v = kv[..., :Dp], kv[..., Dp:]
    s = jnp.einsum("bqd,bkd->bqk", q.astype(jnp.bfloat16), k.astype(jnp.bfloat16),
                   preferred_element_type=jnp.float32)
    p = jax.nn.softmax(s, axis=-1)
    attn = jnp.einsum("bqk,bkd->bqd", p.astype(jnp.bfloat16), v.astype(jnp.bfloat16),
                      preferred_element_type=jnp.float32)
    out = cur_p + _mm(attn, dec.wo, dec.bo)
    logits = _mm(out, dec.wh, dec.bh)
    return logits[..., : dec.num_id_vocabulary + 1]


# -----------------------------------------------------------------------------
# Demo
# -----------------------------------------------------------------------------
if __name__ == "__main__":
    B, T, N, NQ = 2, 4, 8, 8          # batch, history frames, objects/frame, queries
    D_IN, D_MODEL, D_FFN = 16, 32, 64
    NUM_ID_VOCAB = 16

    root = jax.random.PRNGKey(0)
    k_fe, k_tm, k_id, k_ann, k_traj, k_cur = jax.random.split(root, 6)

    model = MOTIP(
        only_detr=False,
        feature_extractor=FeatureExtractor(k_fe, D_IN, D_MODEL),
        trajectory_modeling=TrajectoryModeling(k_tm, D_MODEL, D_FFN),
        id_decoder=IDDecoder(k_id, D_MODEL, NUM_ID_VOCAB),
    )

    # Part 1: feature extractor on raw annotation features.
    annotations = {"features": jax.random.normal(k_ann, (B, N, D_IN), jnp.float32)}
    obj_emb = model(part="feature_extractor", annotations=annotations)
    assert obj_emb.shape == (B, N, D_MODEL)

    # Part 2: trajectory modeling over historical tokens.
    seq_info = {
        "trajectory_features": jax.random.normal(k_traj, (B, T, N, D_MODEL), jnp.float32),
        "current_features": jax.random.normal(k_cur, (B, NQ, D_MODEL), jnp.float32),
    }
    seq_out = model(part="trajectory_modeling", seq_info=seq_info)
    assert seq_out["trajectory_features"].shape == (B, T, N, D_MODEL)

    # Part 3: ID decoder producing ID-vocabulary logits.
    id_logits = model(part="id_decoder", seq_info=seq_out, use_decoder_checkpoint=False)
    assert id_logits.shape == (B, NQ, NUM_ID_VOCAB + 1)

    jax.block_until_ready((obj_emb, seq_out["trajectory_features"], id_logits))

    # Numerical check against a pure-JAX reference that uses the same bf16
    # matmul operands (tolerance covers accumulation order + the EUP
    # approx-reciprocal in the attention softmax).
    ref_emb = _ref_feature_extractor(model.feature_extractor, annotations)
    ref_traj = _ref_trajectory_modeling(model.trajectory_modeling, seq_info)
    ref_logits = _ref_id_decoder(model.id_decoder, seq_out)
    assert bool(jnp.allclose(obj_emb, ref_emb, atol=5e-2, rtol=5e-2))
    assert bool(jnp.allclose(seq_out["trajectory_features"], ref_traj, atol=5e-2, rtol=5e-2))
    assert bool(jnp.allclose(id_logits, ref_logits, atol=5e-2, rtol=5e-2))
    assert bool(jnp.all(jnp.isfinite(id_logits)))
    print("KERNEL_OK")
</pallas_src>

<mosaic_0001>
module attributes {stable_mosaic.version = 11 : i64} {
  func.func @_fused_mlp_kernel(%arg0: i32, %arg1: memref<8x16xf32, #tpu.memory_space<vmem>>, %arg2: memref<16x128xbf16, #tpu.memory_space<vmem>>, %arg3: memref<1x128xf32, #tpu.memory_space<vmem>>, %arg4: memref<128x128xbf16, #tpu.memory_space<vmem>>, %arg5: memref<1x128xf32, #tpu.memory_space<vmem>>, %arg6: memref<8x128xf32, #tpu.memory_space<vmem>>) attributes {dimension_semantics = [#tpu.dimension_semantics<parallel>], iteration_bounds = array<i64: 2>, scalar_prefetch = 0 : i64, scratch_operands = 0 : i64, tpu.core_type = #tpu.core_type<tc>, window_params = [{transform_indices = @transform_0, window_bounds = array<i64: 8, 16>}, {pipeline_mode = #tpu.pipeline_mode<synchronous>, transform_indices = @transform_1, window_bounds = array<i64: 16, 128>}, {pipeline_mode = #tpu.pipeline_mode<synchronous>, transform_indices = @transform_2, window_bounds = array<i64: 1, 128>}, {pipeline_mode = #tpu.pipeline_mode<synchronous>, transform_indices = @transform_3, window_bounds = array<i64: 128, 128>}, {pipeline_mode = #tpu.pipeline_mode<synchronous>, transform_indices = @transform_4, window_bounds = array<i64: 1, 128>}, {transform_indices = @transform_5, window_bounds = array<i64: 8, 128>}]} {
    %c0 = arith.constant 0 : index
    %c0_0 = arith.constant 0 : index
    %0 = vector.load %arg1[%c0, %c0_0] : memref<8x16xf32, #tpu.memory_space<vmem>>, vector<8x16xf32>
    %1 = arith.truncf %0 : vector<8x16xf32> to vector<8x16xbf16>
    %c0_1 = arith.constant 0 : index
    %c0_2 = arith.constant 0 : index
    %2 = vector.load %arg2[%c0_1, %c0_2] : memref<16x128xbf16, #tpu.memory_space<vmem>>, vector<16x128xbf16>
    %cst = arith.constant dense<0.000000e+00> : vector<8x128xf32>
    %3 = tpu.matmul %1, %2, %cst {dimension_numbers = #tpu.dot_dimension_numbers<[1], [0], [0], [1], [0, 0, 1, 1], [], []>} : vector<8x16xbf16>, vector<16x128xbf16>, vector<8x128xf32> -> vector<8x128xf32>
    %c0_3 = arith.constant 0 : index
    %c0_4 = arith.constant 0 : index
    %4 = vector.load %arg3[%c0_3, %c0_4] : memref<1x128xf32, #tpu.memory_space<vmem>>, vector<1x128xf32>
    %5 = vector.broadcast %4 : vector<1x128xf32> to vector<8x128xf32>
    %6 = arith.addf %3, %5 : vector<8x128xf32>
    %cst_5 = arith.constant 0.000000e+00 : f32
    %7 = vector.broadcast %cst_5 : f32 to vector<8x128xf32>
    %8 = arith.maximumf %6, %7 : vector<8x128xf32>
    %9 = arith.truncf %8 : vector<8x128xf32> to vector<8x128xbf16>
    %c0_6 = arith.constant 0 : index
    %c0_7 = arith.constant 0 : index
    %10 = vector.load %arg4[%c0_6, %c0_7] : memref<128x128xbf16, #tpu.memory_space<vmem>>, vector<128x128xbf16>
    %cst_8 = arith.constant dense<0.000000e+00> : vector<8x128xf32>
    %11 = tpu.matmul %9, %10, %cst_8 {dimension_numbers = #tpu.dot_dimension_numbers<[1], [0], [0], [1], [0, 0, 1, 1], [], []>} : vector<8x128xbf16>, vector<128x128xbf16>, vector<8x128xf32> -> vector<8x128xf32>
    %c0_9 = arith.constant 0 : index
    %c0_10 = arith.constant 0 : index
    %12 = vector.load %arg5[%c0_9, %c0_10] : memref<1x128xf32, #tpu.memory_space<vmem>>, vector<1x128xf32>
    %13 = vector.broadcast %12 : vector<1x128xf32> to vector<8x128xf32>
    %14 = arith.addf %11, %13 : vector<8x128xf32>
    %c0_11 = arith.constant 0 : index
    %c0_12 = arith.constant 0 : index
    %15 = vector.load %arg6[%c0_11, %c0_12] : memref<8x128xf32, #tpu.memory_space<vmem>>, vector<8x128xf32>
    tpu.vector_store %arg6[%c0_11, %c0_12], %14 {strides = array<i32>} : memref<8x128xf32, #tpu.memory_space<vmem>>, vector<8x128xf32>,
    return
  }
  func.func @transform_0(%arg0: i32) -> (i32, i32) {
    %c0_i32 = arith.constant 0 : i32
    %c0_i32_0 = arith.constant 0 : i32
    return %arg0, %c0_i32 : i32, i32
  }
  func.func @transform_1(%arg0: i32) -> (i32, i32) {
    %c0_i32 = arith.constant 0 : i32
    %c0_i32_0 = arith.constant 0 : i32
    %c0_i32_1 = arith.constant 0 : i32
    return %c0_i32, %c0_i32_0 : i32, i32
  }
  func.func @transform_2(%arg0: i32) -> (i32, i32) {
    %c0_i32 = arith.constant 0 : i32
    %c0_i32_0 = arith.constant 0 : i32
    %c0_i32_1 = arith.constant 0 : i32
    return %c0_i32, %c0_i32_0 : i32, i32
  }
  func.func @transform_3(%arg0: i32) -> (i32, i32) {
    %c0_i32 = arith.constant 0 : i32
    %c0_i32_0 = arith.constant 0 : i32
    %c0_i32_1 = arith.constant 0 : i32
    return %c0_i32, %c0_i32_0 : i32, i32
  }
  func.func @transform_4(%arg0: i32) -> (i32, i32) {
    %c0_i32 = arith.constant 0 : i32
    %c0_i32_0 = arith.constant 0 : i32
    %c0_i32_1 = arith.constant 0 : i32
    return %c0_i32, %c0_i32_0 : i32, i32
  }
  func.func @transform_5(%arg0: i32) -> (i32, i32) {
    %c0_i32 = arith.constant 0 : i32
    %c0_i32_0 = arith.constant 0 : i32
    return %arg0, %c0_i32 : i32, i32
  }
}

</mosaic_0001>

<bundles_post_ra>
// kernel: tpu_custom_call.1
= control target key start
LH: loop header
LB: loop body
LE: loop exit
PB: predicated region body
PF: predicated region fallthrough
CT: control target
= control target key end

     0   :  { %10 = vsyncpa [#allocation3], 0  ;;  %s1304_s0 = inlined_call_operand.hbm [shape: f32[16,16], index: 0, kind: input, shape index: {}]   ;;  %s1305_s1 = inlined_call_operand.hbm [shape: bf16[16,128], index: 1, kind: input, shape index: {}]   ;;  %s1306_s2 = inlined_call_operand.hbm [shape: f32[1,128], index: 2, kind: input, shape index: {}]   ;;  %s1307_s3 = inlined_call_operand.hbm [shape: bf16[128,128], index: 3, kind: input, shape index: {}]   ;;  %s1308_s4 = inlined_call_operand.hbm [shape: f32[1,128], index: 4, kind: input, shape index: {}]   ;;  %s1309_s5 = inlined_call_operand.hbm [shape: f32[16,128], index: 5, kind: output, shape index: {}]  }
   0x1   :  { %12 = vsyncpa [#allocation3 + $0x1], 0 }
   0x2   :  { %13 = vsyncpa [#allocation6], 0 }
   0x3   :  { %14 = vsyncpa [#allocation9], 0 }
   0x4   :  { %15 = vsyncpa [#allocation4], 0 }
   0x5   :  { %17 = vsyncpa [#allocation4 + $0x1], 0  ;;  %s1019_s18 = smov 0   ;;  %s1021_s19 = smov 0  }
   0x6   :  { %s1023_s20 = smov 0   ;;  %s1025_s21 = smov 0  }
   0x7 LB: > { %s979_s22 = smov [#allocation5]   ;;  %s1040_s24 = sadd.s32 4294967295, %s977_s21   ;;  %s977_s21 = sphi %s1025_s21, %s1333_s21   ;;  %s973_s20 = sphi %s1023_s20, %s1332_s20   ;;  %s969_s19 = sphi %s1021_s19, %s1331_s19   ;;  %s965_s18 = sphi %s1019_s18, %s1330_s18  }
   0x8   : > { %s176_s23 = sshll.u32 %s979_s22, 4  ;;  %p593_p0 = scmp.ge.s32.totalorder %s977_s21, 1  ;;  %s1045_s23 = int_to_ptr.vmem [resolvable:$true] %s176_s23 }
   0x9   : > { %p1310_p1 = scmp.eq.s32.totalorder %s1040_s24, 0  ;;  %p164_p2 = scmp.lt.s32.totalorder %s977_s21, 3 }
   0xa   : > { %s980_s26 = smov [#allocation8]   ;;  %s981_s29 = smov [#allocation7]  }
   0xb   : > { %p1047_p3 = pnand %p593_p0, %p164_p2  ;;  %s200_s27 = sshll.u32 %s980_s26, 4  ;;  %s1060_s27 = int_to_ptr.vmem [resolvable:$true] %s200_s27 }
   0xc   : > { %s190_s30 = sshll.u32 %s981_s29, 4  ;;  %s761_s8 = scalar_lea.hbm %s1305_s1, 128  ;;  %s1062_s30 = int_to_ptr.vmem [resolvable:$true] %s190_s30 }
   0xd   : > { %s1313_s25 = scalar_select %p1047_p3, 1, 0 }
   0xe   : > { %p681_p5 = pneg %p1047_p3  ;;  %p762_p7 = scmp.ne.s32.totalorder %s1305_s1, %s761_s8 }
   0xf   : > { %p768_p11 = scmp.lt.u32.totalorder %s761_s8, %s1305_s1 }
  0x10   : > { %p1056_p6 = pnand %p681_p5, %p1310_p1 }
  0x12   : > { %p1072_p8 = pneg %p1056_p6 }
  0x14   : > { %p764_p9 = pnand %p1072_p8, %p762_p7 }
  0x16   : > { %p765_p10 = pneg %p764_p9 }
  0x18   : > { %p770_p12 = pnand %p768_p11, %p765_p10 }
  0x1a   : > { %773 = shalt.err (!%p770_p12)
}
  0x1b   : > { %s774_s14 = scalar_lea.vmem %s1045_s23, 128  ;;  %p782_p5 = scmp.lt.s32.totalorder %s1045_s23, %s1045_s23 }
  0x1c   : > { %p775_p13 = scmp.ne.s32.totalorder %s1045_s23, %s774_s14  ;;  %p783_p4 = scmp.lt.s32.totalorder %s774_s14, %s774_s14 }
  0x1e   : > { %p777_p0 = pnand %p775_p13, %p1072_p8  ;;  %p784_p7 = por %p783_p4, %p782_p5 }
  0x20   : > { %p778_p2 = pneg %p777_p0 }
  0x22   : > { %p785_p9 = pnand %p784_p7, %p778_p2 }
  0x24   : > { %788 = shalt.err (!%p785_p9)
}
  0x25   : > { %s982_s15 = smov 64   ;;  %s983_s16 = smov 4  }
  0x26   : > { %684 = dma.hbm_to_vmem [thread:$0]  (!%p1056_p6), %s1305_s1, 128, %s1045_s23, [#allocation6], %s982_s15, %s982_s15, %s983_s16  }
  0x27   : > { %s789_s6 = scalar_lea.hbm %s1307_s3, 1024 }
  0x28   : > { %p790_p4 = scmp.ne.s32.totalorder %s1307_s3, %s789_s6  ;;  %p796_p12 = scmp.lt.u32.totalorder %s789_s6, %s1307_s3 }
  0x2a   : > { %p792_p10 = pnand %p790_p4, %p1072_p8 }
  0x2c   : > { %p793_p11 = pneg %p792_p10 }
  0x2e   : > { %p798_p13 = pnand %p796_p12, %p793_p11 }
  0x30   : > { %801 = shalt.err (!%p798_p13)
}
  0x31   : > { %s802_s23 = scalar_lea.vmem %s1060_s27, 1024  ;;  %p810_p7 = scmp.lt.s32.totalorder %s1060_s27, %s1060_s27 }
  0x32   : > { %p803_p0 = scmp.ne.s32.totalorder %s1060_s27, %s802_s23  ;;  %p811_p9 = scmp.lt.s32.totalorder %s802_s23, %s802_s23 }
  0x34   : > { %p805_p2 = pnand %p803_p0, %p1072_p8  ;;  %p812_p4 = por %p811_p9, %p810_p7 }
  0x36   : > { %p806_p5 = pneg %p805_p2 }
  0x38   : > { %p813_p10 = pnand %p812_p4, %p806_p5 }
  0x3a   : > { %816 = shalt.err (!%p813_p10)
}
  0x3b   : > { %690 = dma.hbm_to_vmem [thread:$0]  (!%p1056_p6), %s1307_s3, 1024, %s1060_s27, [#allocation9], %s982_s15, %s982_s15, %s983_s16  }
  0x3c   : > { %s817_s22 = scalar_lea.hbm %s1306_s2, 16 }
  0x3d   : > { %p818_p11 = scmp.ne.s32.totalorder %s1306_s2, %s817_s22  ;;  %p824_p0 = scmp.lt.u32.totalorder %s817_s22, %s1306_s2 }
  0x3f   : > { %p820_p12 = pnand %p818_p11, %p1072_p8 }
  0x41   : > { %p821_p13 = pneg %p820_p12 }
  0x43   : > { %p826_p2 = pnand %p824_p0, %p821_p13 }
  0x45   : > { %829 = shalt.err (!%p826_p2)
}
  0x46   : > { %s830_s27 = scalar_lea.vmem %s1062_s30, 16  ;;  %s837_s15 = scalar_lea.vmem %s1062_s30, 32 }
  0x47   : > { %p831_p5 = scmp.ne.s32.totalorder %s1062_s30, %s830_s27  ;;  %p838_p4 = scmp.lt.s32.totalorder %s1062_s30, %s1062_s30 }
  0x48   : > { %p839_p10 = scmp.lt.s32.totalorder %s837_s15, %s830_s27 }
  0x49   : > { %p833_p7 = pnand %p831_p5, %p1072_p8 }
  0x4a   : > { %p840_p11 = por %p839_p10, %p838_p4 }
  0x4b   : > { %p834_p9 = pneg %p833_p7 }
  0x4d   : > { %p841_p12 = pnand %p840_p11, %p834_p9 }
  0x4f   : > { %844 = shalt.err (!%p841_p12)
}
  0x50   : > { %687 = dma.hbm_to_vmem [thread:$0]  (!%p1056_p6), %s1306_s2, 16, %s1062_s30, [#allocation6]  }
  0x51   : > { %s984_s9 = smov [#allocation10]   ;;  %s845_s13 = scalar_lea.hbm %s1308_s4, 16 }
  0x52   : > { %s214_s10 = sshll.u32 %s984_s9, 4  ;;  %p846_p13 = scmp.ne.s32.totalorder %s1308_s4, %s845_s13  ;;  %s215_s10 = int_to_ptr.vmem [resolvable:$true] %s214_s10 }
  0x53   : > { %p852_p5 = scmp.lt.u32.totalorder %s845_s13, %s1308_s4 }
  0x54   : > { %p848_p0 = pnand %p846_p13, %p1072_p8 }
  0x56   : > { %p849_p2 = pneg %p848_p0 }
  0x58   : > { %p854_p7 = pnand %p852_p5, %p849_p2 }
  0x5a   : > { %857 = shalt.err (!%p854_p7)
}
  0x5b   : > { %s858_s30 = scalar_lea.vmem %s215_s10, 16  ;;  %s865_s29 = scalar_lea.vmem %s215_s10, 32 }
  0x5c   : > { %p859_p9 = scmp.ne.s32.totalorder %s215_s10, %s858_s30  ;;  %p866_p11 = scmp.lt.s32.totalorder %s215_s10, %s215_s10 }
  0x5d   : > { %p867_p12 = scmp.lt.s32.totalorder %s865_s29, %s858_s30 }
  0x5e   : > { %p861_p4 = pnand %p859_p9, %p1072_p8 }
  0x5f   : > { %p868_p1 = por %p867_p12, %p866_p11 }
  0x60   : > { %p862_p10 = pneg %p861_p4 }
  0x62   : > { %p869_p3 = pnand %p868_p1, %p862_p10 }
  0x64   : > { %872 = shalt.err (!%p869_p3)
}
  0x65   : > { %693 = dma.hbm_to_vmem [thread:$0]  (!%p1056_p6), %s1308_s4, 16, %s215_s10, [#allocation9]  }
  0x66   : > { %s592_s11 = sadd.s32 4294967294, %s977_s21   ;;  %s1160_s28 = sadd.s32 1, %s977_s21  }
  0x67   : > { %s27_s27 = ssub.s32 %s977_s21, %s1160_s28  ;;  %s30_s15 = sadd.s32 1, %s973_s20 }
  0x68   : > { %p28_p1 = scmp.eq.s32.totalorder %s27_s27, 0  ;;  %p37_p3 = scmp.ne.s32.totalorder %s973_s20, %s969_s19 }
  0x69   : > { %p38_p8 = scmp.eq.s32.totalorder %s977_s21, 0  ;;  %p43_p13 = scmp.ne.s32.totalorder %s969_s19, %s965_s18 }
  0x6a   : > { %s1171_s16 = scalar_select %p28_p1, %s973_s20, %s30_s15  }
  0x6b   : > { %p1173_p0 = por %p38_p8, %p37_p3  ;;  %p1317_p2 = scmp.eq.s32.totalorder %s1040_s24, 0 }
  0x6c   : > { %p151_p5 = scmp.eq.s32.totalorder %s1040_s24, 1  ;;  %p157_p7 = scmp.eq.s32.totalorder %s592_s11, 1 }
  0x6d   : > { %p1179_p6 = por %p1317_p2, %p43_p13  ;;  %p706_p9 = scmp.lt.s32.totalorder %s977_s21, 2 }
  0x6e   : > { %s225_s10 = sand.u32 1, %s973_s20   ;;  %p1186_p4 = por %p151_p5, %p37_p3 }
  0x6f   : > { %p1190_p10 = por %p157_p7, %p43_p13  ;;  %s599_s13 = sshll.u32 %s225_s10, 3 }
  0x70   : > { %s1319_s23 = scalar_select %p1186_p4, 1, 0 }
  0x71   : > { %s1320_s12 = scalar_select %p1190_p10, 1, 0 }
  0x72   : > { %s600_s14 = sshll.u32 %s977_s21, 7  ;;  %s229_s30 = scalar_lea.vmem [#allocation2], %s599_s13 }
  0x73   : > { %s1198_s26 = scalar_lea.hbm %s1304_s0, %s600_s14  ;;  %s236_s29 = sshll.u32 %s229_s30, 4  ;;  %s1200_s29 = int_to_ptr.vmem [resolvable:$true] %s236_s29 }
  0x74   : > { %p1204_p11 = pnand %p706_p9, %p1173_p0  ;;  %s226_s7 = scalar_lea.sflag [#allocation3], %s225_s10 }
  0x75   : > { %s873_s11 = scalar_lea.hbm %s1198_s26, 128  ;;  %s878_s13 = scalar_lea.hbm %s1304_s0, 256 }
  0x76   : > { %p874_p12 = scmp.ne.s32.totalorder %s1198_s26, %s873_s11  ;;  %p875_p1 = pneg %p1204_p11 }
  0x77   : > { %p879_p13 = scmp.lt.u32.totalorder %s1198_s26, %s1304_s0  ;;  %p880_p0 = scmp.lt.u32.totalorder %s878_s13, %s873_s11 }
  0x78   : > { %p876_p3 = pnand %p875_p1, %p874_p12  ;;  %p882_p5 = scmp.lt.u32.totalorder %s873_s11, %s1198_s26 }
  0x79   : > { %p881_p2 = por %p880_p0, %p879_p13 }
  0x7a   : > { %p877_p8 = pneg %p876_p3 }
  0x7b   : > { %p883_p7 = por %p882_p5, %p881_p2 }
  0x7d   : > { %p884_p9 = pnand %p883_p7, %p877_p8 }
  0x7f   : > { %887 = shalt.err (!%p884_p9)
}
  0x80   : > { %s888_s10 = scalar_lea.vmem %s1200_s29, 128  ;;  %s985_s17 = smov [#allocation2]  }
  0x81   : > { %p889_p12 = scmp.ne.s32.totalorder %s1200_s29, %s888_s10  ;;  %s893_s22 = sshll.u32 %s985_s17, 4  ;;  %s894_s22 = int_to_ptr.vmem [resolvable:$false] %s893_s22 }
  0x82   : > { %s895_s30 = scalar_lea.vmem %s894_s22, 256  ;;  %p896_p4 = scmp.lt.s32.totalorder %s1200_s29, %s894_s22 }
  0x83   : > { %p891_p3 = pnand %p889_p12, %p875_p1  ;;  %p897_p13 = scmp.lt.s32.totalorder %s895_s30, %s888_s10 }
  0x85   : > { %p892_p10 = pneg %p891_p3  ;;  %p898_p0 = por %p897_p13, %p896_p4 }
  0x87   : > { %p899_p2 = pnand %p898_p0, %p892_p10 }
  0x89   : > { %902 = shalt.err (!%p899_p2)
}
  0x8a   : > { %697 = dma.hbm_to_vmem [thread:$0]  (!%p1204_p11), %s1198_s26, 128, %s1200_s29, %s226_s7  }
  0x8b   : > { %p1322_p8 = scmp.ne.s32.totalorder %s1313_s25, 0 }
  0x8c   : > { %s1236_s11 = sand.u32 (!%p1322_p8), 1, %s969_s19  }
  0x8d   : > { %245 = sbr.rel (%p1322_p8) target bundleno = 607 (0x25f), region = 40  ;;  %s602_s27 = sshll.u32 (!%p1322_p8), %s1236_s11, 3 }
  0x8e   : > { %s248_s15 = scalar_lea.sflag (!%p1322_p8), [#allocation3], %s1236_s11  ;;  %s251_s13 = scalar_lea.vmem (!%p1322_p8), [#allocation2], %s602_s27 }
  0x94   : > { %948 = dma.done.wait (%p1179_p6), %s248_s15, 128  }
  0x95   : > { %950 = vsyncadd (%p1179_p6), %s248_s15, 4294967168  ;;  %p1323_p4 = scmp.eq.s32.totalorder %s1040_s24, 0 }
  0x97   : > { %952 = dma.done.wait (%p1323_p4), [#allocation6], 144   ;;  %p1324_p10 = pmov %p1323_p4 }
  0x98   : > { %p1325_p11 = pmov %p1323_p4 }
  0x99   : > { %954 = vsyncadd (%p1324_p10), [#allocation6], 4294967152 }
  0x9a   : > { %956 = dma.done.wait (%p1325_p11), [#allocation9], 1040   ;;  %p1326_p1 = pmov %p1323_p4 }
  0x9b   : > { %v986_v0 = vmov 0.0   ;;  %vm987_vm0 = vmmov 0   ;;  %v752_v1 = vld [vmem:[#allocation5] sm:$0xff]   ;;  %v295_v2 = vld [vmem:[%s251_s13] sm:$0xff]  ;;  %vm312_vm1 = vcmask 130048   ;;  %s621_s25 = sshll.u32 %s1040_s24, 7 }
  0x9c   : > { %958 = vsyncadd (%p1326_p1), [#allocation9], 4294966256  ;;  %635 = vmatprep.subr.bf16.mxu0 %v986_v0  ;;  %637 = vmatprep.mubr.msk.bf16.mxu0 %vm987_vm0, %v986_v0  ;;  %v296_v3 = vpack.c.bf16 %v295_v2, %v295_v2  ;;  %v753_v4 = vld [vmem:[#allocation8] sm:$0xff]   ;;  %v754_v5 = vld [vmem:[#allocation8 + $0x8] sm:$0xff]   ;;  %s293_s9 = scalar_lea.vmem [#allocation11], %s602_s27  ;;  %s1260_s7 = scalar_lea.hbm %s1309_s5, %s621_s25 }
  0x9d   : > { %641 = vmatprep.subr.bf16.mxu1 %v986_v0  ;;  %657 = vmatprep.mubr.msk.bf16.mxu1 %vm987_vm0, %v986_v0  ;;  %v755_v6 = vld [vmem:[#allocation8 + $0x10] sm:$0xff]   ;;  %v756_v7 = vld [vmem:[#allocation8 + $0x18] sm:$0xff]   ;;  %v757_v8 = vld [vmem:[#allocation8 + $0x20] sm:$0xff]   ;;  %s484_s26 = sshll.u32 %s293_s9, 4  ;;  %s471_s24 = scalar_lea.sflag [#allocation4], %s1236_s11  ;;  %s1262_s26 = int_to_ptr.vmem [resolvable:$true] %s484_s26 }
  0x9e   : > { %636 = vmatpush3.bf16.msra.mxu0 %v752_v1  ;;  %642 = vmatpush3.bf16.msra.mxu1 %v753_v4  ;;  %v758_v9 = vld [vmem:[#allocation8 + $0x28] sm:$0xff]   ;;  %v759_v10 = vld [vmem:[#allocation8 + $0x30] sm:$0xff]   ;;  %v760_v11 = vld [vmem:[#allocation8 + $0x38] sm:$0xff]   ;;  %s903_s8 = scalar_lea.vmem %s1262_s26, 128  ;;  %p1327_p5 = scmp.ne.s32.totalorder %s1319_s23, 0 }
  0x9f   : > { %643 = vmatprep.subr.bf16.mxu1 %v986_v0  ;;  %v608_v12 = vld [vmem:[#allocation7] ss:$0 sm:$0xff]  ;;  %v611_v20 = vld [vmem:[#allocation10] ss:$0 sm:$0xff]  ;;  %p904_p6 = scmp.ne.s32.totalorder %s1262_s26, %s903_s8  ;;  %s988_s14 = smov [#allocation11]  }
  0xa0   : > { %s907_s10 = sshll.u32 %s988_s14, 4  ;;  %s908_s10 = int_to_ptr.vmem [resolvable:$false] %s907_s10 }
  0xa1   : > { %638 = vmatmul.mubr.msk.bf16.vlgmr.msra.gmra.mrb[0].mxu0 %vm312_vm1, %v296_v3  ;;  %p905_p7 = pnand %p904_p6, %p1327_p5  ;;  %s909_s17 = scalar_lea.vmem %s908_s10, 256 }
  0xa2   : > { %644 = vmatpush3.bf16.msra.mxu1 %v754_v5  ;;  %p910_p12 = scmp.lt.s32.totalorder %s1262_s26, %s908_s10  ;;  %p911_p3 = scmp.lt.s32.totalorder %s909_s17, %s903_s8 }
  0xa3   : > { %645 = vmatprep.subr.bf16.mxu1 %v986_v0  ;;  %p906_p9 = pneg %p905_p7 }
  0xa4   : > { %p912_p13 = por %p911_p3, %p910_p12 }
  0xa6   : > { %646 = vmatpush3.bf16.msra.mxu1 %v755_v6  ;;  %p913_p0 = pnand %p912_p13, %p906_p9 }
  0xa7   : > { %647 = vmatprep.subr.bf16.mxu1 %v986_v0 }
  0xaa   : > { %648 = vmatpush3.bf16.msra.mxu1 %v756_v7 }
  0xab   : > { %649 = vmatprep.subr.bf16.mxu1 %v986_v0 }
  0xae   : > { %650 = vmatpush3.bf16.msra.mxu1 %v757_v8 }
  0xaf   : > { %651 = vmatprep.subr.bf16.mxu1 %v986_v0 }
  0xb2   : > { %652 = vmatpush3.bf16.msra.mxu1 %v758_v9 }
  0xb3   : > { %653 = vmatprep.subr.bf16.mxu1 %v986_v0 }
  0xb6   : > { %654 = vmatpush3.bf16.msra.mxu1 %v759_v10 }
  0xb7   : > { %655 = vmatprep.subr.bf16.mxu1 %v986_v0 }
  0xba   : > { %656 = vmatpush3.bf16.msra.mxu1 %v760_v11 }
 0x174   : > { %v350_v13 = vpop.f32.mrb[0].mxu0 }
 0x175   : > { %v351_v14 = vadd.f32 %v608_v12, %v350_v13  ;;  %v639_v15 = vpop.f32.mrb[1].mxu0 }
 0x176   : > { %v353_v16 = vpop.f32.mrb[2].mxu0 }
 0x177   : > { %v356_v17 = vmax.f32 %v351_v14, 0.0  ;;  %v640_v18 = vpop.f32.mrb[3].mxu0 }
 0x179   : > { %v357_v19 = vpack.c.bf16 %v356_v17, %v356_v17 }
 0x17b   : > { %658 = vmatmul.mubr.bf16.vlgmr.msra.gmra.mrb[0].mxu1 %v357_v19 }
 0x24e   : > { %v463_v21 = vpop.f32.mrb[0].mxu1 }
 0x24f   : > { %v464_v22 = vadd.f32 %v611_v20, %v463_v21  ;;  %v659_v23 = vpop.f32.mrb[1].mxu1 }
 0x250   : > { %v466_v24 = vpop.f32.mrb[2].mxu1 }
 0x251   : > { %469 = vst [vmem:[%s293_s9] sm:$0xff] %v464_v22  ;;  %v660_v25 = vpop.f32.mrb[3].mxu1 }
 0x252   : > { %916 = shalt.err (!%p913_p0)
}
 0x253   : > { %s917_s22 = scalar_lea.hbm %s1260_s7, 128  ;;  %s921_s27 = scalar_lea.hbm %s1309_s5, 256 }
 0x254   : > { %p918_p2 = scmp.ne.s32.totalorder %s1260_s7, %s917_s22  ;;  %p922_p10 = scmp.lt.u32.totalorder %s1260_s7, %s1309_s5 }
 0x255   : > { %p923_p11 = scmp.lt.u32.totalorder %s921_s27, %s917_s22  ;;  %p925_p6 = scmp.lt.u32.totalorder %s917_s22, %s1260_s7 }
 0x256   : > { %p919_p8 = pnand %p918_p2, %p1327_p5 }
 0x257   : > { %p924_p1 = por %p923_p11, %p922_p10 }
 0x258   : > { %p920_p4 = pneg %p919_p8 }
 0x259   : > { %p926_p7 = por %p925_p6, %p924_p1 }
 0x25b   : > { %p927_p9 = pnand %p926_p7, %p920_p4 }
 0x25d   : > { %930 = shalt.err (!%p927_p9)
}
 0x25e   : > { %679 = dma.vmem_to_hbm [thread:$0]  (%p1327_p5), %s1262_s26, 128, %s1260_s7, %s471_s24  }
 0x25f PF: > { %s496_s25 = sand.u32 1, %s965_s18   ;;  %p1328_p12 = scmp.ne.s32.totalorder %s1320_s12, 0 }
 0x260   : > { %p1329_p3 = scmp.ge.s32.totalorder %s977_s21, 2  ;;  %s497_s9 = scalar_lea.sflag [#allocation4], %s496_s25 }
 0x262   : > { %p699_p13 = pnand %p1329_p3, %p1328_p12 }
 0x264   : > { %960 = dma.done.wait (!%p699_p13), %s497_s9, 128  }
 0x265   : > { %962 = vsyncadd (!%p699_p13), %s497_s9, 4294967168  ;;  %p20_p0 = scmp.ge.s32.totalorder %s1160_s28, 4   ;;  %s1330_s18 = smov %s969_s19 }
 0x266   : > { %s1331_s19 = smov %s973_s20  ;;  %s1332_s20 = smov %s1171_s16 }
 0x267   : > { %s1333_s21 = smov %s1160_s28  ;;  %22 = sbr.rel (!%p20_p0) target bundleno = 7 (0x7), region = 101 }
 0x26e   :  { %502 = vsyncpa [#allocation3], 1 }
 0x26f   :  { %504 = vsyncpa [#allocation3 + $0x1], 1 }
 0x270   :  { %505 = vsyncpa [#allocation6], 1 }
 0x271   :  { %506 = vsyncpa [#allocation9], 1 }
 0x272   :  { %507 = vsyncpa [#allocation4], 1 }
 0x273   :  { %509 = vsyncpa [#allocation4 + $0x1], 1 }

</bundles_post_ra>
